<compile_context>
chip_gen: v6e
topology: v6e:2x2x1
jax: 0.10.0
libtpu: 0.0.40
codegen_flags: <defaults>
</compile_context>

<pallas_src>
import functools
import math

import jax
import jax.numpy as jnp
from jax.experimental import pallas as pl
from jax.experimental.pallas import tpu as pltpu


def _round_up(x, m):
    return ((x + m - 1) // m) * m


def _align_lanes(d):
    # 256-aligned widths feed the 2x256^2 MXUs on v6e/v7x without partial
    # passes; below 256 the 128-lane minimum is enough (and wastes less).
    return _round_up(d, 256) if d >= 256 else _round_up(d, 128)


def _vmem_budget_bytes():
    cap = 128 * 2 ** 20
    try:
        info = pltpu.get_tpu_info()
        cap = int(getattr(info, "vmem_capacity_bytes", cap))
    except Exception:
        pass
    # Leave headroom for Mosaic internal scratch / double buffers:
    # ~48 MiB on v7x (64 MiB physical), 96 MiB cap on v5e/v6e (128 MiB).
    return int(min(cap * 3 // 4, 96 * 2 ** 20))


def _pad2(a, rows, cols):
    pr, pc = rows - a.shape[0], cols - a.shape[1]
    if pr == 0 and pc == 0:
        return a
    return jnp.pad(a, ((0, pr), (0, pc)))


def _pick_tm(M, cap):
    tm = min(cap, _round_up(M, 8))
    # Guarantee >=2 row tiles so both v7x TensorCores get "parallel" work.
    if M >= 16 and _round_up(M, tm) // tm < 2:
        tm = _round_up((M + 1) // 2, 8)
    return tm


def _masked_layernorm_f32(xf, g_f, b_f, *, eps, d_valid):
    """LayerNorm over the first d_valid lanes of a lane-padded f32 tile.

    Matches the PyTorch module: unbiased variance, sqrt(std**2 + eps)."""
    lane = jax.lax.broadcasted_iota(jnp.int32, xf.shape, xf.ndim - 1)
    valid = lane < d_valid
    xm = jnp.where(valid, xf, 0.0)
    mean = jnp.sum(xm, axis=-1, keepdims=True) / d_valid
    diff = jnp.where(valid, xf - mean, 0.0)
    var = jnp.sum(diff * diff, axis=-1, keepdims=True) / (d_valid - 1)
    inv = jax.lax.rsqrt(var + eps)
    return g_f * diff * inv + b_f


# ----------------------------------------------------------------------------
# Fast path: all N FFN layers + final LayerNorm fused in one kernel.
# Weights (stacked over layers) are VMEM-resident across all row tiles.
# ----------------------------------------------------------------------------
def _fused_decoder_kernel(x_ref, w1_ref, b1_ref, w2_ref, b2_ref, g_ref, bb_ref,
                          o_ref, *, n_layers, eps, d_valid):
    # x_ref: (tm, dm_p)
    # w1_ref: (N, dm_p, dff_p)  b1_ref: (N, 1, dff_p)
    # w2_ref: (N, dff_p, dm_p)  b2_ref: (N, 1, dm_p)
    # g_ref, bb_ref: (1, dm_p)  o_ref: (tm, dm_p)
    x = x_ref[...]
    dt = x.dtype
    for l in range(n_layers):                      # static unroll, N is small
        h = jnp.dot(x, w1_ref[l], preferred_element_type=jnp.float32)
        h = jnp.maximum(h + b1_ref[l].astype(jnp.float32), 0.0)   # ReLU
        # dropout: eval-mode identity
        y = jnp.dot(h.astype(dt), w2_ref[l], preferred_element_type=jnp.float32)
        x = (y + b2_ref[l].astype(jnp.float32)).astype(dt)
    out = _masked_layernorm_f32(x.astype(jnp.float32),
                                g_ref[...].astype(jnp.float32),
                                bb_ref[...].astype(jnp.float32),
                                eps=eps, d_valid=d_valid)
    o_ref[...] = out.astype(o_ref.dtype)


def _fused_decoder_padded(x_p, w1s, b1s, w2s, b2s, g_p, b_p, *,
                          tm, d_model, d_ff, eps, vmem_limit):
    M_p, dm_p = x_p.shape
    n_layers, _, dff_p = w1s.shape
    isz = jnp.dtype(x_p.dtype).itemsize
    cost = pl.CostEstimate(
        flops=int(4 * M_p * d_model * d_ff * n_layers),
        transcendentals=int(M_p),
        bytes_accessed=int((2 * M_p * dm_p
                            + n_layers * (2 * dm_p * dff_p + dff_p + dm_p)
                            + 2 * dm_p) * isz))
    kern = functools.partial(_fused_decoder_kernel, n_layers=n_layers,
                             eps=eps, d_valid=d_model)
    return pl.pallas_call(
        kern,
        out_shape=jax.ShapeDtypeStruct((M_p, dm_p), x_p.dtype),
        grid_spec=pltpu.PrefetchScalarGridSpec(
            num_scalar_prefetch=0,
            grid=(M_p // tm,),
            in_specs=[
                pl.BlockSpec((tm, dm_p), lambda i: (i, 0)),
                # Constant block indices -> weights stay VMEM-resident.
                pl.BlockSpec((n_layers, dm_p, dff_p), lambda i: (0, 0, 0)),
                pl.BlockSpec((n_layers, 1, dff_p), lambda i: (0, 0, 0)),
                pl.BlockSpec((n_layers, dff_p, dm_p), lambda i: (0, 0, 0)),
                pl.BlockSpec((n_layers, 1, dm_p), lambda i: (0, 0, 0)),
                pl.BlockSpec((1, dm_p), lambda i: (0, 0)),
                pl.BlockSpec((1, dm_p), lambda i: (0, 0)),
            ],
            out_specs=pl.BlockSpec((tm, dm_p), lambda i: (i, 0)),
        ),
        compiler_params=pltpu.CompilerParams(
            dimension_semantics=("parallel",),
            vmem_limit_bytes=int(vmem_limit)),
        cost_estimate=cost,
    )(x_p, w1s, b1s, w2s, b2s, g_p, b_p)


# ----------------------------------------------------------------------------
# Fallback path: per-layer k-tiled FFN (+ separate LayerNorm pass).
# ----------------------------------------------------------------------------
def _ffn_kernel(x_ref, w1_ref, b1_ref, w2_ref, b2_ref, o_ref, acc_ref):
    # x_ref: (tm, dm_p)  w1_ref: (dm_p, tk)  b1_ref: (1, tk)
    # w2_ref: (tk, dm_p) b2_ref: (1, dm_p)   o_ref: (tm, dm_p)
    k = pl.program_id(1)

    @pl.when(k == 0)
    def _():
        # Accumulator starts at b2 -> no bias add on the epilogue path.
        acc_ref[...] = jnp.broadcast_to(
            b2_ref[...].astype(jnp.float32), acc_ref.shape)

    x = x_ref[...]                                    # native dtype -> MXU rate
    h = jnp.dot(x, w1_ref[...], preferred_element_type=jnp.float32)
    h = jnp.maximum(h + b1_ref[...].astype(jnp.float32), 0.0)   # ReLU
    # dropout: eval-mode identity
    acc_ref[...] += jnp.dot(h.astype(x.dtype), w2_ref[...],
                            preferred_element_type=jnp.float32)

    @pl.when(k == pl.num_programs(1) - 1)
    def _():
        o_ref[...] = acc_ref[...].astype(o_ref.dtype)


def _ffn_padded(x_p, w1_p, b1_p, w2_p, b2_p, *, tm, tk, d_model, d_ff,
                vmem_limit):
    M_p, dm_p = x_p.shape
    dff_p = w1_p.shape[1]
    isz = jnp.dtype(x_p.dtype).itemsize
    grid = (M_p // tm, dff_p // tk)
    weight_reads = grid[0] if grid[1] > 1 else 1   # resident when single k step
    cost = pl.CostEstimate(
        flops=int(4 * M_p * d_model * d_ff),
        transcendentals=0,
        bytes_accessed=int((2 * M_p * dm_p
                            + weight_reads * (2 * dm_p * dff_p + dff_p + dm_p))
                           * isz))
    return pl.pallas_call(
        _ffn_kernel,
        out_shape=jax.ShapeDtypeStruct((M_p, dm_p), x_p.dtype),
        grid_spec=pltpu.PrefetchScalarGridSpec(
            num_scalar_prefetch=0,
            grid=grid,                      # rows parallel, d_ff reduction last
            in_specs=[
                pl.BlockSpec((tm, dm_p), lambda i, k: (i, 0)),
                pl.BlockSpec((dm_p, tk), lambda i, k: (0, k)),
                pl.BlockSpec((1, tk), lambda i, k: (0, k)),
                pl.BlockSpec((tk, dm_p), lambda i, k: (k, 0)),
                pl.BlockSpec((1, dm_p), lambda i, k: (0, 0)),
            ],
            out_specs=pl.BlockSpec((tm, dm_p), lambda i, k: (i, 0)),
            scratch_shapes=[pltpu.VMEM((tm, dm_p), jnp.float32)],
        ),
        compiler_params=pltpu.CompilerParams(
            dimension_semantics=("parallel", "arbitrary"),
            vmem_limit_bytes=int(vmem_limit)),
        cost_estimate=cost,
    )(x_p, w1_p, b1_p, w2_p, b2_p)


def _layernorm_kernel(x_ref, g_ref, b_ref, o_ref, *, eps, d_valid):
    out = _masked_layernorm_f32(x_ref[...].astype(jnp.float32),
                                g_ref[...].astype(jnp.float32),
                                b_ref[...].astype(jnp.float32),
                                eps=eps, d_valid=d_valid)
    o_ref[...] = out.astype(o_ref.dtype)


def _layer_norm_padded(x_p, g_p, b_p, *, tm, d_model, eps):
    M_p, dm_p = x_p.shape
    kern = functools.partial(_layernorm_kernel, eps=eps, d_valid=d_model)
    return pl.pallas_call(
        kern,
        out_shape=jax.ShapeDtypeStruct((M_p, dm_p), x_p.dtype),
        grid_spec=pltpu.PrefetchScalarGridSpec(
            num_scalar_prefetch=0,
            grid=(M_p // tm,),
            in_specs=[
                pl.BlockSpec((tm, dm_p), lambda i: (i, 0)),
                pl.BlockSpec((1, dm_p), lambda i: (0, 0)),
                pl.BlockSpec((1, dm_p), lambda i: (0, 0)),
            ],
            out_specs=pl.BlockSpec((tm, dm_p), lambda i: (i, 0)),
        ),
        compiler_params=pltpu.CompilerParams(
            dimension_semantics=("parallel",)),
    )(x_p, g_p, b_p)


# ----------------------------------------------------------------------------
# Decoder forward: N cloned layers, then the final LayerNorm.
# ----------------------------------------------------------------------------
def decoder_forward(x, layer_params, norm_gamma, norm_beta, *, eps=1e-6,
                    force_per_layer=False):
    """layer_params: list of (w1_t (d_model,d_ff), b1 (d_ff,),
                              w2_t (d_ff,d_model), b2 (d_model,)).
    Weights are accepted pre-transposed (matmul-ready) — the one-time
    transpose is hoisted out of the hot path into parameter setup."""
    # TODO(synk): DecoderLayer's attention sublayers / masks / residual
    # connections are not defined in the provided snippet; each cloned layer
    # here applies its position-wise feed-forward sublayer only.
    batch, seq, d_model = x.shape
    n_layers = len(layer_params)
    d_ff = layer_params[0][0].shape[1]
    M = batch * seq
    isz = jnp.dtype(x.dtype).itemsize

    dm_p = _align_lanes(d_model)
    dff_p = _align_lanes(d_ff)
    budget = _vmem_budget_bytes()

    tm = _pick_tm(M, 512)
    M_p = _round_up(M, tm)

    # Pad once (hoisted out of the layer loop).  Zero padding is exact for the
    # FFN (padded weight rows/cols are zero) and masked out in the LayerNorm.
    x_p = _pad2(x.reshape(M, d_model), M_p, dm_p)
    g_p = _pad2(norm_gamma.reshape(1, d_model), 1, dm_p)
    b_p = _pad2(norm_beta.reshape(1, d_model), 1, dm_p)

    # --- fused fast path: all weights VMEM-resident, LN in the epilogue -----
    w_bytes = n_layers * (2 * dm_p * dff_p + dff_p + dm_p) * isz
    act_bytes = 4 * tm * dm_p * isz                    # double-buffered in/out
    hid_bytes = tm * dff_p * 4 + 2 * tm * dm_p * 4     # f32 intermediates
    fused_need = 2 * w_bytes + act_bytes + hid_bytes + (4 << 20)
    # TODO(synk): pipeline_mode=pl.Buffered(1) on the grid-invariant weight
    # specs would roughly halve `2 * w_bytes` and widen this path on v7x.

    if (not force_per_layer) and fused_need <= budget:
        w1s = jnp.stack([_pad2(p[0], dm_p, dff_p) for p in layer_params])
        b1s = jnp.stack([_pad2(p[1].reshape(1, d_ff), 1, dff_p)
                         for p in layer_params])
        w2s = jnp.stack([_pad2(p[2], dff_p, dm_p) for p in layer_params])
        b2s = jnp.stack([_pad2(p[3].reshape(1, d_model), 1, dm_p)
                         for p in layer_params])
        vmem_limit = min(budget, max(32 << 20, fused_need))
        out_p = _fused_decoder_padded(x_p, w1s, b1s, w2s, b2s, g_p, b_p,
                                      tm=tm, d_model=d_model, d_ff=d_ff,
                                      eps=eps, vmem_limit=vmem_limit)
    else:
        # --- fallback: per-layer k-tiled FFN + one LayerNorm pass -----------
        dff128 = _round_up(d_ff, 128)

        def step_bytes(tk_):
            return (2 * (tm * dm_p + dm_p * tk_ + tk_ + tk_ * dm_p + dm_p
                         + tm * dm_p) * isz
                    + tm * dm_p * 4 + tm * tk_ * 4)

        candidates = [dff128] + [t for t in (2048, 1024, 512, 256, 128)
                                 if t < dff128]
        tk = candidates[-1]
        for t in candidates:
            if step_bytes(t) + (4 << 20) <= budget:
                tk = t
                break
        dff_pb = _round_up(d_ff, tk)
        vmem_limit = min(budget, max(32 << 20, step_bytes(tk) + (4 << 20)))

        for (w1_t, b1, w2_t, b2) in layer_params:
            x_p = _ffn_padded(x_p,
                              _pad2(w1_t, dm_p, dff_pb),
                              _pad2(b1.reshape(1, d_ff), 1, dff_pb),
                              _pad2(w2_t, dff_pb, dm_p),
                              _pad2(b2.reshape(1, d_model), 1, dm_p),
                              tm=tm, tk=tk, d_model=d_model, d_ff=d_ff,
                              vmem_limit=vmem_limit)
        # TODO(synk): could fuse this LN into the last layer's FFN epilogue.
        out_p = _layer_norm_padded(x_p, g_p, b_p, tm=tm, d_model=d_model,
                                   eps=eps)

    # Un-pad once (hoisted out of the layer loop).
    return out_p[:M, :d_model].reshape(batch, seq, d_model)


if __name__ == "__main__":
    batch, seq, d_model, d_ff, n_layers = 2, 8, 32, 64, 2
    eps = 1e-6

    key = jax.random.PRNGKey(0)
    kx, *pk = jax.random.split(key, 1 + 4 * n_layers)
    x = jax.random.normal(kx, (batch, seq, d_model), dtype=jnp.float32)

    layer_params = []
    for l in range(n_layers):
        kw1, kb1, kw2, kb2 = pk[4 * l:4 * l + 4]
        bound1 = 1.0 / math.sqrt(d_model)
        w1 = jax.random.uniform(kw1, (d_ff, d_model), jnp.float32, -bound1, bound1)
        b1 = jax.random.uniform(kb1, (d_ff,), jnp.float32, -bound1, bound1)
        bound2 = 1.0 / math.sqrt(d_ff)
        w2 = jax.random.uniform(kw2, (d_model, d_ff), jnp.float32, -bound2, bound2)
        b2 = jax.random.uniform(kb2, (d_model,), jnp.float32, -bound2, bound2)
        # One-time transpose to matmul-ready layout (hoisted out of hot path).
        layer_params.append((w1.T, b1, w2.T, b2))

    gamma = jnp.ones((d_model,), jnp.float32)   # PyTorch LayerNorm init a_2
    beta = jnp.zeros((d_model,), jnp.float32)   # PyTorch LayerNorm init b_2

    # Fused fast path (weights resident, LN fused in epilogue).
    y_fused = jax.block_until_ready(
        decoder_forward(x, layer_params, gamma, beta, eps=eps))
    # Fallback path (per-layer k-tiled FFN + LN kernel), exercised for coverage.
    y_layer = jax.block_until_ready(
        decoder_forward(x, layer_params, gamma, beta, eps=eps,
                        force_per_layer=True))

    # Plain-JAX reference of the same composition (eval-mode dropout).
    ref = x
    for (w1_t, b1, w2_t, b2) in layer_params:
        ref = jnp.maximum(ref @ w1_t + b1, 0.0) @ w2_t + b2
    mean = ref.mean(-1, keepdims=True)
    var = jnp.sum((ref - mean) ** 2, axis=-1, keepdims=True) / (d_model - 1)
    ref = gamma * (ref - mean) / jnp.sqrt(var + eps) + beta

    assert y_fused.shape == (batch, seq, d_model)
    assert jnp.allclose(y_fused, ref, atol=1e-4, rtol=1e-4), \
        float(jnp.max(jnp.abs(y_fused - ref)))
    assert jnp.allclose(y_layer, ref, atol=1e-4, rtol=1e-4), \
        float(jnp.max(jnp.abs(y_layer - ref)))

    print("KERNEL_OK")
</pallas_src>

<mosaic_0001>
module attributes {stable_mosaic.version = 11 : i64} {
  func.func @_fused_decoder_kernel(%arg0: i32, %arg1: memref<8x128xf32, #tpu.memory_space<vmem>>, %arg2: memref<2x128x128xf32, #tpu.memory_space<vmem>>, %arg3: memref<2x1x128xf32, #tpu.memory_space<vmem>>, %arg4: memref<2x128x128xf32, #tpu.memory_space<vmem>>, %arg5: memref<2x1x128xf32, #tpu.memory_space<vmem>>, %arg6: memref<1x128xf32, #tpu.memory_space<vmem>>, %arg7: memref<1x128xf32, #tpu.memory_space<vmem>>, %arg8: memref<8x128xf32, #tpu.memory_space<vmem>>) attributes {dimension_semantics = [#tpu.dimension_semantics<parallel>], iteration_bounds = array<i64: 2>, scalar_prefetch = 0 : i64, scratch_operands = 0 : i64, tpu.core_type = #tpu.core_type<tc>, window_params = [{transform_indices = @transform_0, window_bounds = array<i64: 8, 128>}, {pipeline_mode = #tpu.pipeline_mode<synchronous>, transform_indices = @transform_1, window_bounds = array<i64: 2, 128, 128>}, {pipeline_mode = #tpu.pipeline_mode<synchronous>, transform_indices = @transform_2, window_bounds = array<i64: 2, 1, 128>}, {pipeline_mode = #tpu.pipeline_mode<synchronous>, transform_indices = @transform_3, window_bounds = array<i64: 2, 128, 128>}, {pipeline_mode = #tpu.pipeline_mode<synchronous>, transform_indices = @transform_4, window_bounds = array<i64: 2, 1, 128>}, {pipeline_mode = #tpu.pipeline_mode<synchronous>, transform_indices = @transform_5, window_bounds = array<i64: 1, 128>}, {pipeline_mode = #tpu.pipeline_mode<synchronous>, transform_indices = @transform_6, window_bounds = array<i64: 1, 128>}, {transform_indices = @transform_7, window_bounds = array<i64: 8, 128>}]} {
    %c0 = arith.constant 0 : index
    %c0_0 = arith.constant 0 : index
    %0 = vector.load %arg1[%c0, %c0_0] : memref<8x128xf32, #tpu.memory_space<vmem>>, vector<8x128xf32>
    %c0_1 = arith.constant 0 : index
    %c0_2 = arith.constant 0 : index
    %c0_3 = arith.constant 0 : index
    %1 = vector.load %arg2[%c0_1, %c0_2, %c0_3] : memref<2x128x128xf32, #tpu.memory_space<vmem>>, vector<1x128x128xf32>
    %2 = vector.shape_cast %1 : vector<1x128x128xf32> to vector<128x128xf32>
    %cst = arith.constant dense<0.000000e+00> : vector<8x128xf32>
    %3 = tpu.matmul %0, %2, %cst {dimension_numbers = #tpu.dot_dimension_numbers<[1], [0], [0], [1], [0, 0, 1, 1], [], []>} : vector<8x128xf32>, vector<128x128xf32>, vector<8x128xf32> -> vector<8x128xf32>
    %c0_4 = arith.constant 0 : index
    %c0_5 = arith.constant 0 : index
    %c0_6 = arith.constant 0 : index
    %4 = vector.load %arg3[%c0_4, %c0_5, %c0_6] : memref<2x1x128xf32, #tpu.memory_space<vmem>>, vector<1x1x128xf32>
    %5 = vector.shape_cast %4 : vector<1x1x128xf32> to vector<1x128xf32>
    %6 = vector.broadcast %5 : vector<1x128xf32> to vector<8x128xf32>
    %7 = arith.addf %3, %6 : vector<8x128xf32>
    %cst_7 = arith.constant 0.000000e+00 : f32
    %8 = vector.broadcast %cst_7 : f32 to vector<8x128xf32>
    %9 = arith.maximumf %7, %8 : vector<8x128xf32>
    %c0_8 = arith.constant 0 : index
    %c0_9 = arith.constant 0 : index
    %c0_10 = arith.constant 0 : index
    %10 = vector.load %arg4[%c0_8, %c0_9, %c0_10] : memref<2x128x128xf32, #tpu.memory_space<vmem>>, vector<1x128x128xf32>
    %11 = vector.shape_cast %10 : vector<1x128x128xf32> to vector<128x128xf32>
    %cst_11 = arith.constant dense<0.000000e+00> : vector<8x128xf32>
    %12 = tpu.matmul %9, %11, %cst_11 {dimension_numbers = #tpu.dot_dimension_numbers<[1], [0], [0], [1], [0, 0, 1, 1], [], []>} : vector<8x128xf32>, vector<128x128xf32>, vector<8x128xf32> -> vector<8x128xf32>
    %c0_12 = arith.constant 0 : index
    %c0_13 = arith.constant 0 : index
    %c0_14 = arith.constant 0 : index
    %13 = vector.load %arg5[%c0_12, %c0_13, %c0_14] : memref<2x1x128xf32, #tpu.memory_space<vmem>>, vector<1x1x128xf32>
    %14 = vector.shape_cast %13 : vector<1x1x128xf32> to vector<1x128xf32>
    %15 = vector.broadcast %14 : vector<1x128xf32> to vector<8x128xf32>
    %16 = arith.addf %12, %15 : vector<8x128xf32>
    %c1 = arith.constant 1 : index
    %c0_15 = arith.constant 0 : index
    %c0_16 = arith.constant 0 : index
    %17 = vector.load %arg2[%c1, %c0_15, %c0_16] : memref<2x128x128xf32, #tpu.memory_space<vmem>>, vector<1x128x128xf32>
    %18 = vector.shape_cast %17 : vector<1x128x128xf32> to vector<128x128xf32>
    %cst_17 = arith.constant dense<0.000000e+00> : vector<8x128xf32>
    %19 = tpu.matmul %16, %18, %cst_17 {dimension_numbers = #tpu.dot_dimension_numbers<[1], [0], [0], [1], [0, 0, 1, 1], [], []>} : vector<8x128xf32>, vector<128x128xf32>, vector<8x128xf32> -> vector<8x128xf32>
    %c1_18 = arith.constant 1 : index
    %c0_19 = arith.constant 0 : index
    %c0_20 = arith.constant 0 : index
    %20 = vector.load %arg3[%c1_18, %c0_19, %c0_20] : memref<2x1x128xf32, #tpu.memory_space<vmem>>, vector<1x1x128xf32>
    %21 = vector.shape_cast %20 : vector<1x1x128xf32> to vector<1x128xf32>
    %22 = vector.broadcast %21 : vector<1x128xf32> to vector<8x128xf32>
    %23 = arith.addf %19, %22 : vector<8x128xf32>
    %cst_21 = arith.constant 0.000000e+00 : f32
    %24 = vector.broadcast %cst_21 : f32 to vector<8x128xf32>
    %25 = arith.maximumf %23, %24 : vector<8x128xf32>
    %c1_22 = arith.constant 1 : index
    %c0_23 = arith.constant 0 : index
    %c0_24 = arith.constant 0 : index
    %26 = vector.load %arg4[%c1_22, %c0_23, %c0_24] : memref<2x128x128xf32, #tpu.memory_space<vmem>>, vector<1x128x128xf32>
    %27 = vector.shape_cast %26 : vector<1x128x128xf32> to vector<128x128xf32>
    %cst_25 = arith.constant dense<0.000000e+00> : vector<8x128xf32>
    %28 = tpu.matmul %25, %27, %cst_25 {dimension_numbers = #tpu.dot_dimension_numbers<[1], [0], [0], [1], [0, 0, 1, 1], [], []>} : vector<8x128xf32>, vector<128x128xf32>, vector<8x128xf32> -> vector<8x128xf32>
    %c1_26 = arith.constant 1 : index
    %c0_27 = arith.constant 0 : index
    %c0_28 = arith.constant 0 : index
    %29 = vector.load %arg5[%c1_26, %c0_27, %c0_28] : memref<2x1x128xf32, #tpu.memory_space<vmem>>, vector<1x1x128xf32>
    %30 = vector.shape_cast %29 : vector<1x1x128xf32> to vector<1x128xf32>
    %31 = vector.broadcast %30 : vector<1x128xf32> to vector<8x128xf32>
    %32 = arith.addf %28, %31 : vector<8x128xf32>
    %c0_29 = arith.constant 0 : index
    %c0_30 = arith.constant 0 : index
    %33 = vector.load %arg6[%c0_29, %c0_30] : memref<1x128xf32, #tpu.memory_space<vmem>>, vector<1x128xf32>
    %c0_31 = arith.constant 0 : index
    %c0_32 = arith.constant 0 : index
    %34 = vector.load %arg7[%c0_31, %c0_32] : memref<1x128xf32, #tpu.memory_space<vmem>>, vector<1x128xf32>
    %35 = tpu.iota {dimensions = array<i32: 1>} : vector<8x128xi32>
    %c32_i32 = arith.constant 32 : i32
    %36 = vector.broadcast %c32_i32 : i32 to vector<8x128xi32>
    %37 = arith.cmpi slt, %35, %36 : vector<8x128xi32>
    %cst_33 = arith.constant 0.000000e+00 : f32
    %38 = vector.broadcast %cst_33 : f32 to vector<8x128xf32>
    %39 = arith.select %37, %32, %38 : vector<8x128xi1>, vector<8x128xf32>
    %cst_34 = arith.constant dense<0.000000e+00> : vector<8xf32>
    %40 = vector.multi_reduction <add>, %39, %cst_34 [1] : vector<8x128xf32> to vector<8xf32>
    %41 = vector.shape_cast %40 : vector<8xf32> to vector<8x1xf32>
    %cst_35 = arith.constant 3.200000e+01 : f32
    %42 = vector.broadcast %cst_35 : f32 to vector<8x1xf32>
    %43 = arith.divf %41, %42 : vector<8x1xf32>
    %44 = vector.broadcast %43 : vector<8x1xf32> to vector<8x128xf32>
    %45 = arith.subf %32, %44 : vector<8x128xf32>
    %cst_36 = arith.constant 0.000000e+00 : f32
    %46 = vector.broadcast %cst_36 : f32 to vector<8x128xf32>
    %47 = arith.select %37, %45, %46 : vector<8x128xi1>, vector<8x128xf32>
    %48 = arith.mulf %47, %47 : vector<8x128xf32>
    %cst_37 = arith.constant dense<0.000000e+00> : vector<8xf32>
    %49 = vector.multi_reduction <add>, %48, %cst_37 [1] : vector<8x128xf32> to vector<8xf32>
    %50 = vector.shape_cast %49 : vector<8xf32> to vector<8x1xf32>
    %cst_38 = arith.constant 3.100000e+01 : f32
    %51 = vector.broadcast %cst_38 : f32 to vector<8x1xf32>
    %52 = arith.divf %50, %51 : vector<8x1xf32>
    %cst_39 = arith.constant 9.99999997E-7 : f32
    %53 = vector.broadcast %cst_39 : f32 to vector<8x1xf32>
    %54 = arith.addf %52, %53 : vector<8x1xf32>
    %55 = math.rsqrt %54 : vector<8x1xf32>
    %56 = vector.broadcast %33 : vector<1x128xf32> to vector<8x128xf32>
    %57 = arith.mulf %56, %47 : vector<8x128xf32>
    %58 = vector.broadcast %55 : vector<8x1xf32> to vector<8x128xf32>
    %59 = arith.mulf %57, %58 : vector<8x128xf32>
    %60 = vector.broadcast %34 : vector<1x128xf32> to vector<8x128xf32>
    %61 = arith.addf %59, %60 : vector<8x128xf32>
    %c0_40 = arith.constant 0 : index
    %c0_41 = arith.constant 0 : index
    %62 = vector.load %arg8[%c0_40, %c0_41] : memref<8x128xf32, #tpu.memory_space<vmem>>, vector<8x128xf32>
    tpu.vector_store %arg8[%c0_40, %c0_41], %61 {strides = array<i32>} : memref<8x128xf32, #tpu.memory_space<vmem>>, vector<8x128xf32>,
    return
  }
  func.func @transform_0(%arg0: i32) -> (i32, i32) {
    %c0_i32 = arith.constant 0 : i32
    %c0_i32_0 = arith.constant 0 : i32
    return %arg0, %c0_i32 : i32, i32
  }
  func.func @transform_1(%arg0: i32) -> (i32, i32, i32) {
    %c0_i32 = arith.constant 0 : i32
    %c0_i32_0 = arith.constant 0 : i32
    %c0_i32_1 = arith.constant 0 : i32
    %c0_i32_2 = arith.constant 0 : i32
    return %c0_i32, %c0_i32_0, %c0_i32_1 : i32, i32, i32
  }
  func.func @transform_2(%arg0: i32) -> (i32, i32, i32) {
    %c0_i32 = arith.constant 0 : i32
    %c0_i32_0 = arith.constant 0 : i32
    %c0_i32_1 = arith.constant 0 : i32
    %c0_i32_2 = arith.constant 0 : i32
    return %c0_i32, %c0_i32_0, %c0_i32_1 : i32, i32, i32
  }
  func.func @transform_3(%arg0: i32) -> (i32, i32, i32) {
    %c0_i32 = arith.constant 0 : i32
    %c0_i32_0 = arith.constant 0 : i32
    %c0_i32_1 = arith.constant 0 : i32
    %c0_i32_2 = arith.constant 0 : i32
    return %c0_i32, %c0_i32_0, %c0_i32_1 : i32, i32, i32
  }
  func.func @transform_4(%arg0: i32) -> (i32, i32, i32) {
    %c0_i32 = arith.constant 0 : i32
    %c0_i32_0 = arith.constant 0 : i32
    %c0_i32_1 = arith.constant 0 : i32
    %c0_i32_2 = arith.constant 0 : i32
    return %c0_i32, %c0_i32_0, %c0_i32_1 : i32, i32, i32
  }
  func.func @transform_5(%arg0: i32) -> (i32, i32) {
    %c0_i32 = arith.constant 0 : i32
    %c0_i32_0 = arith.constant 0 : i32
    %c0_i32_1 = arith.constant 0 : i32
    return %c0_i32, %c0_i32_0 : i32, i32
  }
  func.func @transform_6(%arg0: i32) -> (i32, i32) {
    %c0_i32 = arith.constant 0 : i32
    %c0_i32_0 = arith.constant 0 : i32
    %c0_i32_1 = arith.constant 0 : i32
    return %c0_i32, %c0_i32_0 : i32, i32
  }
  func.func @transform_7(%arg0: i32) -> (i32, i32) {
    %c0_i32 = arith.constant 0 : i32
    %c0_i32_0 = arith.constant 0 : i32
    return %arg0, %c0_i32 : i32, i32
  }
}

</mosaic_0001>

<bundles_post_ra>
// kernel: tpu_custom_call.1
= control target key start
LH: loop header
LB: loop body
LE: loop exit
PB: predicated region body
PF: predicated region fallthrough
CT: control target
= control target key end

     0   :  { %s1605_s0 = inlined_call_operand.hbm [shape: f32[16,128], index: 0, kind: input, shape index: {}]   ;;  %s1606_s1 = inlined_call_operand.hbm [shape: f32[2,128,128], index: 1, kind: input, shape index: {}]   ;;  %s1607_s2 = inlined_call_operand.vmem [shape: f32[2,1,128], index: 2, kind: input, shape index: {}]   ;;  %s1608_s3 = inlined_call_operand.hbm [shape: f32[2,128,128], index: 3, kind: input, shape index: {}]   ;;  %s1609_s4 = inlined_call_operand.vmem [shape: f32[2,1,128], index: 4, kind: input, shape index: {}]   ;;  %s1610_s5 = inlined_call_operand.vmem [shape: f32[1,128], index: 5, kind: input, shape index: {}]   ;;  %s1611_s6 = inlined_call_operand.vmem [shape: f32[1,128], index: 6, kind: input, shape index: {}]   ;;  %s1612_s7 = inlined_call_operand.hbm [shape: f32[16,128], index: 7, kind: output, shape index: {}]  }
   0x1   :  { %1617 = sst [smem:[#allocation12_spill]] %s1606_s1 }
   0x2   :  { %1618 = sst [smem:[#allocation13_spill]] %s1608_s3 }
   0x3   :  { %12 = vsyncpa [#allocation3], 0 }
   0x4   :  { %14 = vsyncpa [#allocation3 + $0x1], 0 }
   0x5   :  { %15 = vsyncpa [#allocation6], 0 }
   0x6   :  { %16 = vsyncpa [#allocation4], 0 }
   0x7   :  { %18 = vsyncpa [#allocation4 + $0x1], 0  ;;  %s1343_s24 = smov 0   ;;  %s1345_s25 = smov 0  }
   0x8   :  { %s1347_s26 = smov 0   ;;  %s1349_s27 = smov 0  }
   0x9 LB: > { %s1364_s28 = sadd.s32 4294967295, %s1293_s27   ;;  %s840_s29 = sadd.s32 4294967294, %s1293_s27   ;;  %s1293_s27 = sphi %s1349_s27, %s1638_s27   ;;  %s1289_s26 = sphi %s1347_s26, %s1637_s26   ;;  %s1285_s25 = sphi %s1345_s25, %s1636_s25   ;;  %s1281_s24 = sphi %s1343_s24, %s1635_s24  }
   0xa   : > { %p44_p0 = scmp.ne.s32.totalorder %s1285_s25, %s1281_s24  ;;  %p1613_p1 = scmp.eq.s32.totalorder %s1364_s28, 0 }
   0xb   : > { %p200_p3 = scmp.eq.s32.totalorder %s840_s29, 1  ;;  %p841_p5 = scmp.ge.s32.totalorder %s1293_s27, 1 }
   0xc   : > { %p1373_p4 = por %p1613_p1, %p44_p0  ;;  %p207_p7 = scmp.lt.s32.totalorder %s1293_s27, 3 }
   0xd   : > { %p1378_p6 = por %p200_p3, %p44_p0  ;;  %s1295_s10 = smov [#allocation5]  }
   0xe   : > { %s1619_s30 = scalar_select %p1373_p4, 1, 0 }
   0xf   : > { %s1620_s8 = scalar_select %p1378_p6, 1, 0 }
  0x10   : > { %p1383_p8 = pnand %p841_p5, %p207_p7  ;;  %s219_s11 = sshll.u32 %s1295_s10, 4  ;;  %s220_s11 = int_to_ptr.vmem [resolvable:$true] %s219_s11 }
  0x11   : > { %s1296_s13 = smov [#allocation7]   ;;  %s1156_s15 = scalar_lea.vmem %s220_s11, 4096 }
  0x12   : > { %s1621_s9 = scalar_select %p1383_p8, 1, 0 }
  0x13   : > { %p1084_p9 = pneg %p1383_p8  ;;  %s235_s14 = sshll.u32 %s1296_s13, 4  ;;  %s236_s14 = int_to_ptr.vmem [resolvable:$true] %s235_s14 }
  0x14   : > { %p1157_p13 = scmp.ne.s32.totalorder %s220_s11, %s1156_s15  ;;  %p1164_p5 = scmp.lt.s32.totalorder %s220_s11, %s220_s11 }
  0x15   : > { %p1392_p11 = pnand %p1084_p9, %p1613_p1  ;;  %p1165_p7 = scmp.lt.s32.totalorder %s1156_s15, %s1156_s15 }
  0x17   : > { %p1147_p12 = pneg %p1392_p11  ;;  %p1166_p10 = por %p1165_p7, %p1164_p5 }
  0x19   : > { %p1159_p0 = pnand %p1157_p13, %p1147_p12 }
  0x1b   : > { %p1160_p3 = pneg %p1159_p0 }
  0x1d   : > { %p1167_p9 = pnand %p1166_p10, %p1160_p3 }
  0x1f   : > { %1170 = shalt.err (!%p1167_p9)
}
  0x20   : > { %s1297_s16 = smov 128   ;;  %s1298_s17 = smov 8  }
  0x21   : > { %s1623_s1 = sld [smem:[#allocation12_spill]]  ;;  %s1182_s20 = scalar_lea.vmem %s236_s14, 4096 }
  0x22   : > { %p1183_p1 = scmp.ne.s32.totalorder %s236_s14, %s1182_s20  ;;  %p1190_p2 = scmp.lt.s32.totalorder %s236_s14, %s236_s14 }
  0x23   : > { %p1191_p6 = scmp.lt.s32.totalorder %s1182_s20, %s1182_s20 }
  0x24   : > { %p1185_p13 = pnand %p1183_p1, %p1147_p12 }
  0x25   : > { %p1192_p5 = por %p1191_p6, %p1190_p2 }
  0x26   : > { %p1186_p0 = pneg %p1185_p13 }
  0x27   : > { %1087 = dma.hbm_to_vmem [thread:$0]  (!%p1392_p11), %s1623_s1, 4096, %s220_s11, [#allocation6], %s1297_s16, %s1297_s16, %s1298_s17  }
  0x28   : > { %p1193_p10 = pnand %p1192_p5, %p1186_p0 }
  0x2a   : > { %1196 = shalt.err (!%p1193_p10)
}
  0x2b   : > { %s1624_s3 = sld [smem:[#allocation13_spill]]  ;;  %s1415_s23 = sadd.s32 1, %s1293_s27  }
  0x2c   : > { %s31_s29 = sadd.s32 1, %s1289_s26  ;;  %s28_s10 = ssub.s32 %s1293_s27, %s1415_s23 }
  0x2d   : > { %p38_p1 = scmp.ne.s32.totalorder %s1289_s26, %s1285_s25  ;;  %p29_p2 = scmp.eq.s32.totalorder %s28_s10, 0 }
  0x2e   : > { %p39_p6 = scmp.eq.s32.totalorder %s1293_s27, 0  ;;  %p1625_p12 = scmp.eq.s32.totalorder %s1364_s28, 1 }
  0x2f   : > { %p1101_p7 = scmp.lt.s32.totalorder %s1293_s27, 2  ;;  %s258_s13 = sand.u32 1, %s1289_s26  }
  0x30   : > { %p1425_p3 = por %p1625_p12, %p38_p1  ;;  %p40_p9 = por %p39_p6, %p38_p1 }
  0x31   : > { %1090 = dma.hbm_to_vmem [thread:$0]  (!%p1392_p11), %s1624_s3, 4096, %s236_s14, [#allocation6], %s1297_s16, %s1297_s16, %s1298_s17  }
  0x32   : > { %s1626_s11 = scalar_select %p1425_p3, 1, 0 }
  0x33   : > { %s1431_s12 = scalar_select %p29_p2, %s1289_s26, %s31_s29  }
  0x34   : > { %s845_s15 = sshll.u32 %s258_s13, 3  ;;  %s846_s14 = sshll.u32 %s1293_s27, 7 }
  0x35   : > { %s1438_s18 = scalar_lea.hbm %s1605_s0, %s846_s14  ;;  %s262_s19 = scalar_lea.vmem [#allocation2], %s845_s15 }
  0x36   : > { %s269_s20 = sshll.u32 %s262_s19, 4  ;;  %p1440_p11 = pnand %p1101_p7, %p40_p9  ;;  %s270_s20 = int_to_ptr.vmem [resolvable:$true] %s269_s20 }
  0x37   : > { %s259_s22 = scalar_lea.sflag [#allocation3], %s258_s13  ;;  %s1197_s29 = scalar_lea.hbm %s1438_s18, 128 }
  0x38   : > { %p1198_p13 = scmp.ne.s32.totalorder %s1438_s18, %s1197_s29  ;;  %p1199_p0 = pneg %p1440_p11 }
  0x39   : > { %s1202_s16 = scalar_lea.hbm %s1605_s0, 256  ;;  %p1203_p1 = scmp.lt.s32.totalorder %s1438_s18, %s1605_s0 }
  0x3a   : > { %p1200_p5 = pnand %p1199_p0, %p1198_p13  ;;  %p1204_p2 = scmp.lt.s32.totalorder %s1202_s16, %s1197_s29 }
  0x3c   : > { %p1201_p10 = pneg %p1200_p5  ;;  %p1205_p6 = por %p1204_p2, %p1203_p1 }
  0x3e   : > { %p1206_p12 = pnand %p1205_p6, %p1201_p10 }
  0x40   : > { %1209 = shalt.err (!%p1206_p12)
}
  0x41   : > { %s1210_s19 = scalar_lea.vmem %s270_s20, 128  ;;  %s1299_s13 = smov [#allocation2]  }
  0x42   : > { %p1211_p7 = scmp.ne.s32.totalorder %s270_s20, %s1210_s19  ;;  %s1215_s1 = sshll.u32 %s1299_s13, 4  ;;  %s1216_s1 = int_to_ptr.vmem [resolvable:$false] %s1215_s1 }
  0x43   : > { %s1217_s3 = scalar_lea.vmem %s1216_s1, 256  ;;  %p1218_p13 = scmp.lt.s32.totalorder %s270_s20, %s1216_s1 }
  0x44   : > { %p1213_p9 = pnand %p1211_p7, %p1199_p0  ;;  %p1219_p5 = scmp.lt.s32.totalorder %s1217_s3, %s1210_s19 }
  0x46   : > { %p1214_p3 = pneg %p1213_p9  ;;  %p1220_p4 = por %p1219_p5, %p1218_p13 }
  0x48   : > { %p1221_p8 = pnand %p1220_p4, %p1214_p3 }
  0x4a   : > { %1224 = shalt.err (!%p1221_p8)
}
  0x4b   : > { %1094 = dma.hbm_to_vmem [thread:$0]  (!%p1440_p11), %s1438_s18, 128, %s270_s20, %s259_s22  }
  0x4c   : > { %p1628_p10 = scmp.ne.s32.totalorder %s1621_s9, 0 }
  0x4d   : > { %s1461_s29 = sand.u32 (!%p1628_p10), 1, %s1285_s25   ;;  %p1629_p4 = scmp.ne.s32.totalorder (!%p1628_p10), %s1619_s30, 0 }
  0x4e   : > { %278 = sbr.rel (%p1628_p10) target bundleno = 1224 (0x4c8), region = 48  ;;  %s848_s10 = sshll.u32 (!%p1628_p10), %s1461_s29, 3 }
  0x4f   : > { %s281_s1 = scalar_lea.sflag (!%p1628_p10), [#allocation3], %s1461_s29  ;;  %s1467_s3 = scalar_lea.vmem (!%p1628_p10), [#allocation2], %s848_s10 }
  0x53   : > { %1268 = dma.done.wait (%p1629_p4), %s281_s1, 128  }
  0x54   : > { %1270 = vsyncadd (%p1629_p4), %s281_s1, 4294967168  ;;  %p1630_p8 = scmp.eq.s32.totalorder %s1364_s28, 0 }
  0x56   : > { %1272 = dma.done.wait (%p1630_p8), [#allocation6], 8192   ;;  %p1631_p3 = pmov %p1630_p8 }
  0x57   : > { %v1300_v0 = vmov 0.0   ;;  %vm1301_vm0 = vmmov 0   ;;  %v339_v1 = vld [vmem:[#allocation5 + $0x78] sm:$0xff]  ;;  %v338_v2 = vld [vmem:[#allocation5 + $0x70] sm:$0xff]  ;;  %v337_v3 = vld [vmem:[#allocation5 + $0x68] sm:$0xff]  ;;  %s861_s1 = sshll.u32 %s1364_s28, 7 }
  0x58   : > { %1274 = vsyncadd (%p1631_p3), [#allocation6], 4294959104  ;;  %932 = vmatprep.subr.mxu0 %v1300_v0  ;;  %964 = vmatprep.mubr.msk.f32.mxu0 %vm1301_vm0, %v1300_v0  ;;  %v336_v4 = vld [vmem:[#allocation5 + $0x60] sm:$0xff]  ;;  %v433_v5 = vld [vmem:[#allocation7 + $0x78] sm:$0xff]  ;;  %s749_s20 = scalar_lea.hbm %s1612_s7, %s861_s1  ;;  %s738_s21 = scalar_lea.sflag [#allocation4], %s1461_s29 }
  0x59   : > { %967 = vmatprep.subr.mxu1 %v1300_v0  ;;  %999 = vmatprep.mubr.msk.f32.mxu1 %vm1301_vm0, %v1300_v0  ;;  %v335_v6 = vld [vmem:[#allocation5 + $0x58] sm:$0xff]  ;;  %v432_v7 = vld [vmem:[#allocation7 + $0x70] sm:$0xff]  ;;  %v431_v8 = vld [vmem:[#allocation7 + $0x68] sm:$0xff]  ;;  %p1632_p0 = scmp.ne.s32.totalorder %s1626_s11, 0  ;;  %s1302_s14 = smov [#allocation8]  }
  0x5a   : > { %933 = vmatpush3.msra.mxu0 %v339_v1  ;;  %968 = vmatpush3.msra.mxu1 %v433_v5  ;;  %v334_v9 = vld [vmem:[#allocation5 + $0x50] sm:$0xff]  ;;  %v430_v10 = vld [vmem:[#allocation7 + $0x60] sm:$0xff]  ;;  %v333_v11 = vld [vmem:[#allocation5 + $0x48] sm:$0xff]  ;;  %s1229_s16 = sshll.u32 %s1302_s14, 4  ;;  %s1230_s16 = int_to_ptr.vmem [resolvable:$false] %s1229_s16 }
  0x5b   : > { %934 = vmatprep.subr.mxu0 %v1300_v0  ;;  %969 = vmatprep.subr.mxu1 %v1300_v0  ;;  %v429_v12 = vld [vmem:[#allocation7 + $0x58] sm:$0xff]  ;;  %v332_v13 = vld [vmem:[#allocation5 + $0x40] sm:$0xff]  ;;  %v428_v14 = vld [vmem:[#allocation7 + $0x50] sm:$0xff]  ;;  %s1231_s28 = scalar_lea.vmem %s1230_s16, 256 }
  0x5c   : > { %935 = vmatpush3.msra.mxu0 %v338_v2  ;;  %970 = vmatpush3.msra.mxu1 %v432_v7  ;;  %v331_v15 = vld [vmem:[#allocation5 + $0x38] sm:$0xff]  ;;  %v427_v16 = vld [vmem:[#allocation7 + $0x48] sm:$0xff]  ;;  %v330_v17 = vld [vmem:[#allocation5 + $0x30] sm:$0xff] }
  0x5d   : > { %936 = vmatprep.subr.mxu0 %v1300_v0  ;;  %971 = vmatprep.subr.mxu1 %v1300_v0  ;;  %v426_v18 = vld [vmem:[#allocation7 + $0x40] sm:$0xff]  ;;  %v329_v19 = vld [vmem:[#allocation5 + $0x28] sm:$0xff]  ;;  %v425_v20 = vld [vmem:[#allocation7 + $0x38] sm:$0xff] }
  0x5e   : > { %937 = vmatpush3.msra.mxu0 %v337_v3  ;;  %972 = vmatpush3.msra.mxu1 %v431_v8  ;;  %v328_v21 = vld [vmem:[#allocation5 + $0x20] sm:$0xff]  ;;  %v424_v22 = vld [vmem:[#allocation7 + $0x30] sm:$0xff]  ;;  %v327_v23 = vld [vmem:[#allocation5 + $0x18] sm:$0xff] }
  0x5f   : > { %938 = vmatprep.subr.mxu0 %v1300_v0  ;;  %973 = vmatprep.subr.mxu1 %v1300_v0  ;;  %v423_v24 = vld [vmem:[#allocation7 + $0x28] sm:$0xff]  ;;  %v326_v25 = vld [vmem:[#allocation5 + $0x10] sm:$0xff]  ;;  %v422_v26 = vld [vmem:[#allocation7 + $0x20] sm:$0xff] }
  0x60   : > { %939 = vmatpush3.msra.mxu0 %v336_v4  ;;  %974 = vmatpush3.msra.mxu1 %v430_v10  ;;  %v325_v27 = vld [vmem:[#allocation5 + $0x8] sm:$0xff]  ;;  %v421_v28 = vld [vmem:[#allocation7 + $0x18] sm:$0xff]  ;;  %v324_v29 = vld [vmem:[#allocation5] sm:$0xff] }
  0x61   : > { %940 = vmatprep.subr.mxu0 %v1300_v0  ;;  %975 = vmatprep.subr.mxu1 %v1300_v0  ;;  %v323_v30 = vld [vmem:[%s1467_s3] sm:$0xff]  ;;  %v419_v32 = vld [vmem:[#allocation7 + $0x8] sm:$0xff]  ;;  %v418_v33 = vld [vmem:[#allocation7] sm:$0xff]  ;;  %s322_s3 = scalar_lea.vmem [#allocation8], %s848_s10 }
  0x62   : > { %941 = vmatpush3.msra.mxu0 %v335_v6  ;;  %976 = vmatpush3.msra.mxu1 %v429_v12  ;;  %v420_v31 = vld [vmem:[#allocation7 + $0x10] sm:$0xff]  ;;  %v527_v34 = vld [vmem:[#allocation5 + $0xf8] sm:$0xff]  ;;  %v525_v36 = vld [vmem:[#allocation5 + $0xe8] sm:$0xff]  ;;  %s751_s30 = sshll.u32 %s322_s3, 4  ;;  %s752_s30 = int_to_ptr.vmem [resolvable:$true] %s751_s30 }
  0x63   : > { %942 = vmatprep.subr.mxu0 %v1300_v0  ;;  %977 = vmatprep.subr.mxu1 %v1300_v0  ;;  %v526_v35 = vld [vmem:[#allocation5 + $0xf0] sm:$0xff]  ;;  %v524_v37 = vld [vmem:[#allocation5 + $0xe0] sm:$0xff]  ;;  %v523_v38 = vld [vmem:[#allocation5 + $0xd8] sm:$0xff]  ;;  %s1225_s22 = scalar_lea.vmem %s752_s30, 128  ;;  %p1232_p6 = scmp.lt.s32.totalorder %s752_s30, %s1230_s16 }
  0x64   : > { %943 = vmatpush3.msra.mxu0 %v334_v9  ;;  %978 = vmatpush3.msra.mxu1 %v428_v14  ;;  %v522_v39 = vld [vmem:[#allocation5 + $0xd0] sm:$0xff]  ;;  %v521_v40 = vld [vmem:[#allocation5 + $0xc8] sm:$0xff]  ;;  %v520_v41 = vld [vmem:[#allocation5 + $0xc0] sm:$0xff]  ;;  %p1226_p11 = scmp.ne.s32.totalorder %s752_s30, %s1225_s22  ;;  %p1233_p12 = scmp.lt.s32.totalorder %s1231_s28, %s1225_s22 }
  0x65   : > { %944 = vmatprep.subr.mxu0 %v1300_v0  ;;  %979 = vmatprep.subr.mxu1 %v1300_v0  ;;  %v519_v42 = vld [vmem:[#allocation5 + $0xb8] sm:$0xff]  ;;  %v518_v43 = vld [vmem:[#allocation5 + $0xb0] sm:$0xff]  ;;  %v517_v44 = vld [vmem:[#allocation5 + $0xa8] sm:$0xff] }
  0x66   : > { %945 = vmatpush3.msra.mxu0 %v333_v11  ;;  %980 = vmatpush3.msra.mxu1 %v427_v16  ;;  %v516_v45 = vld [vmem:[#allocation5 + $0xa0] sm:$0xff]  ;;  %v515_v46 = vld [vmem:[#allocation5 + $0x98] sm:$0xff]  ;;  %v514_v47 = vld [vmem:[#allocation5 + $0x90] sm:$0xff]  ;;  %p1227_p1 = pnand %p1226_p11, %p1632_p0  ;;  %p1234_p7 = por %p1233_p12, %p1232_p6 }
  0x67   : > { %946 = vmatprep.subr.mxu0 %v1300_v0  ;;  %981 = vmatprep.subr.mxu1 %v1300_v0  ;;  %v852_v48 = vld [vmem:[%s1607_s2] ss:$0 sm:$0xff]  ;;  %v513_v53 = vld [vmem:[#allocation5 + $0x88] sm:$0xff]  ;;  %v512_v54 = vld [vmem:[#allocation5 + $0x80] sm:$0xff] }
  0x68   : > { %947 = vmatpush3.msra.mxu0 %v332_v13  ;;  %982 = vmatpush3.msra.mxu1 %v426_v18  ;;  %v623_v55 = vld [vmem:[#allocation7 + $0xf8] sm:$0xff]  ;;  %v622_v56 = vld [vmem:[#allocation7 + $0xf0] sm:$0xff]  ;;  %v621_v57 = vld [vmem:[#allocation7 + $0xe8] sm:$0xff]  ;;  %p1228_p2 = pneg %p1227_p1 }
  0x69   : > { %948 = vmatprep.subr.mxu0 %v1300_v0  ;;  %983 = vmatprep.subr.mxu1 %v1300_v0  ;;  %v620_v58 = vld [vmem:[#allocation7 + $0xe0] sm:$0xff]  ;;  %v619_v59 = vld [vmem:[#allocation7 + $0xd8] sm:$0xff]  ;;  %v618_v60 = vld [vmem:[#allocation7 + $0xd0] sm:$0xff] }
  0x6a   : > { %949 = vmatpush3.msra.mxu0 %v331_v15  ;;  %984 = vmatpush3.msra.mxu1 %v425_v20  ;;  %v617_v61 = vld [vmem:[#allocation7 + $0xc8] sm:$0xff]  ;;  %v616_v62 = vld [vmem:[#allocation7 + $0xc0] sm:$0xff]  ;;  %v615_v63 = vld [vmem:[#allocation7 + $0xb8] sm:$0xff]  ;;  %p1235_p9 = pnand %p1234_p7, %p1228_p2 }
  0x6b   : > { %950 = vmatprep.subr.mxu0 %v1300_v0  ;;  %985 = vmatprep.subr.mxu1 %v1300_v0  ;;  %v614_v1 = vld [vmem:[#allocation7 + $0xb0] sm:$0xff]  ;;  %v613_v2 = vld [vmem:[#allocation7 + $0xa8] sm:$0xff]  ;;  %v612_v3 = vld [vmem:[#allocation7 + $0xa0] sm:$0xff] }
  0x6c   : > { %951 = vmatpush3.msra.mxu0 %v330_v17  ;;  %986 = vmatpush3.msra.mxu1 %v424_v22  ;;  %v611_v4 = vld [vmem:[#allocation7 + $0x98] sm:$0xff]  ;;  %v853_v5 = vld [vmem:[%s1609_s4] ss:$0 sm:$0xff]  ;;  %v609_v10 = vld [vmem:[#allocation7 + $0x88] sm:$0xff]  ;;  %v704_v17 = vlaneseq }
  0x6d   : > { %952 = vmatprep.subr.mxu0 %v1300_v0  ;;  %987 = vmatprep.subr.mxu1 %v1300_v0  ;;  %v610_v9 = vld [vmem:[#allocation7 + $0x90] sm:$0xff]  ;;  %v608_v11 = vld [vmem:[#allocation7 + $0x80] sm:$0xff] }
  0x6e   : > { %953 = vmatpush3.msra.mxu0 %v329_v19  ;;  %988 = vmatpush3.msra.mxu1 %v423_v24  ;;  %v855_v12 = vld [vmem:[%s1607_s2 + $0x1] ss:$0 sm:$0xff]  ;;  %v705_v18 = vand.u32 127, %v704_v17 }
  0x6f   : > { %954 = vmatprep.subr.mxu0 %v1300_v0  ;;  %989 = vmatprep.subr.mxu1 %v1300_v0  ;;  %v857_v19 = vld [vmem:[%s1609_s4 + $0x1] ss:$0 sm:$0xff] }
  0x70   : > { %955 = vmatpush3.msra.mxu0 %v328_v21  ;;  %990 = vmatpush3.msra.mxu1 %v422_v26  ;;  %vm706_vm1 = vcmp.lt.s32.totalorder %v705_v18, 32 }
  0x71   : > { %956 = vmatprep.subr.mxu0 %v1300_v0  ;;  %991 = vmatprep.subr.mxu1 %v1300_v0 }
  0x72   : > { %957 = vmatpush3.msra.mxu0 %v327_v23  ;;  %992 = vmatpush3.msra.mxu1 %v421_v28 }
  0x73   : > { %958 = vmatprep.subr.mxu0 %v1300_v0  ;;  %993 = vmatprep.subr.mxu1 %v1300_v0 }
  0x74   : > { %959 = vmatpush3.msra.mxu0 %v326_v25  ;;  %994 = vmatpush3.msra.mxu1 %v420_v31  ;;  %v858_v31 = vld [vmem:[%s1610_s5] ss:$0 sm:$0xff] }
  0x75   : > { %960 = vmatprep.subr.mxu0 %v1300_v0  ;;  %995 = vmatprep.subr.mxu1 %v1300_v0 }
  0x76   : > { %961 = vmatpush3.msra.mxu0 %v325_v27  ;;  %996 = vmatpush3.msra.mxu1 %v419_v32 }
  0x77   : > { %962 = vmatprep.subr.mxu0 %v1300_v0  ;;  %997 = vmatprep.subr.mxu1 %v1300_v0 }
  0x78   : > { %963 = vmatpush3.msra.mxu0 %v324_v29  ;;  %998 = vmatpush3.msra.mxu1 %v418_v33 }
  0x79   : > { %965 = vmatmul.mubr.f32.vlgmr.msra.gmra.mxu0 %v323_v30  ;;  %1002 = vmatprep.subr.mxu0 %v1300_v0 }
  0x7a   : > { %1034 = vmatprep.mubr.msk.f32.mxu0 %vm1301_vm0, %v1300_v0  ;;  %1037 = vmatprep.subr.mxu1 %v1300_v0 }
  0x7b   : > { %1003 = vmatpush3.msra.mxu0 %v527_v34  ;;  %v859_v34 = vld [vmem:[%s1611_s6] ss:$0 sm:$0xff] }
  0x7c   : > { %1004 = vmatprep.subr.mxu0 %v1300_v0 }
  0x7d   : > { %1005 = vmatpush3.msra.mxu0 %v526_v35 }
  0x7e   : > { %1006 = vmatprep.subr.mxu0 %v1300_v0 }
  0x7f   : > { %1007 = vmatpush3.msra.mxu0 %v525_v36 }
  0x80   : > { %1008 = vmatprep.subr.mxu0 %v1300_v0 }
  0x81   : > { %1009 = vmatpush3.msra.mxu0 %v524_v37 }
  0x82   : > { %1010 = vmatprep.subr.mxu0 %v1300_v0 }
  0x83   : > { %1011 = vmatpush3.msra.mxu0 %v523_v38 }
  0x84   : > { %1012 = vmatprep.subr.mxu0 %v1300_v0 }
  0x85   : > { %1013 = vmatpush3.msra.mxu0 %v522_v39 }
  0x86   : > { %1014 = vmatprep.subr.mxu0 %v1300_v0 }
  0x87   : > { %1015 = vmatpush3.msra.mxu0 %v521_v40 }
  0x88   : > { %1016 = vmatprep.subr.mxu0 %v1300_v0 }
  0x89   : > { %1017 = vmatpush3.msra.mxu0 %v520_v41 }
  0x8a   : > { %1018 = vmatprep.subr.mxu0 %v1300_v0 }
  0x8b   : > { %1019 = vmatpush3.msra.mxu0 %v519_v42 }
  0x8c   : > { %1020 = vmatprep.subr.mxu0 %v1300_v0 }
  0x8d   : > { %1021 = vmatpush3.msra.mxu0 %v518_v43 }
  0x8e   : > { %1022 = vmatprep.subr.mxu0 %v1300_v0 }
  0x8f   : > { %1023 = vmatpush3.msra.mxu0 %v517_v44 }
  0x90   : > { %1024 = vmatprep.subr.mxu0 %v1300_v0 }
  0x91   : > { %1025 = vmatpush3.msra.mxu0 %v516_v45 }
  0x92   : > { %1026 = vmatprep.subr.mxu0 %v1300_v0 }
  0x93   : > { %1027 = vmatpush3.msra.mxu0 %v515_v46 }
  0x94   : > { %1028 = vmatprep.subr.mxu0 %v1300_v0 }
  0x95   : > { %1029 = vmatpush3.msra.mxu0 %v514_v47 }
  0x96   : > { %1030 = vmatprep.subr.mxu0 %v1300_v0 }
  0x97   : > { %1031 = vmatpush3.msra.mxu0 %v513_v53 }
  0x98   : > { %1032 = vmatprep.subr.mxu0 %v1300_v0 }
  0x99   : > { %1033 = vmatpush3.msra.mxu0 %v512_v54 }
 0x139   : > { %v413_v49 = vpop.f32.mrf.mxu0 }
 0x13a   : > { %v414_v50 = vadd.f32 %v852_v48, %v413_v49 }
 0x13b   : > { %v966_v51 = vpop.f32.mrf.mxu0 }
 0x13c   : > { %v417_v52 = vmax.f32 %v414_v50, 0.0 }
 0x13e   : > { %1000 = vmatmul.mubr.f32.vlgmr.msra.gmra.mxu1 %v417_v52 }
 0x13f   : > { %1069 = vmatprep.mubr.msk.f32.mxu1 %vm1301_vm0, %v1300_v0  ;;  %1038 = vmatpush3.msra.mxu1 %v623_v55 }
 0x140   : > { %1039 = vmatprep.subr.mxu1 %v1300_v0 }
 0x141   : > { %1040 = vmatpush3.msra.mxu1 %v622_v56 }
 0x142   : > { %1041 = vmatprep.subr.mxu1 %v1300_v0 }
 0x143   : > { %1042 = vmatpush3.msra.mxu1 %v621_v57 }
 0x144   : > { %1043 = vmatprep.subr.mxu1 %v1300_v0 }
 0x145   : > { %1044 = vmatpush3.msra.mxu1 %v620_v58 }
 0x146   : > { %1045 = vmatprep.subr.mxu1 %v1300_v0 }
 0x147   : > { %1046 = vmatpush3.msra.mxu1 %v619_v59 }
 0x148   : > { %1047 = vmatprep.subr.mxu1 %v1300_v0 }
 0x149   : > { %1048 = vmatpush3.msra.mxu1 %v618_v60 }
 0x14a   : > { %1049 = vmatprep.subr.mxu1 %v1300_v0 }
 0x14b   : > { %1050 = vmatpush3.msra.mxu1 %v617_v61 }
 0x14c   : > { %1051 = vmatprep.subr.mxu1 %v1300_v0 }
 0x14d   : > { %1052 = vmatpush3.msra.mxu1 %v616_v62 }
 0x14e   : > { %1053 = vmatprep.subr.mxu1 %v1300_v0 }
 0x14f   : > { %1054 = vmatpush3.msra.mxu1 %v615_v63 }
 0x150   : > { %1055 = vmatprep.subr.mxu1 %v1300_v0 }
 0x151   : > { %1056 = vmatpush3.msra.mxu1 %v614_v1 }
 0x152   : > { %1057 = vmatprep.subr.mxu1 %v1300_v0 }
 0x153   : > { %1058 = vmatpush3.msra.mxu1 %v613_v2 }
 0x154   : > { %1059 = vmatprep.subr.mxu1 %v1300_v0 }
 0x155   : > { %1060 = vmatpush3.msra.mxu1 %v612_v3 }
 0x156   : > { %1061 = vmatprep.subr.mxu1 %v1300_v0 }
 0x157   : > { %1062 = vmatpush3.msra.mxu1 %v611_v4 }
 0x158   : > { %1063 = vmatprep.subr.mxu1 %v1300_v0 }
 0x159   : > { %1064 = vmatpush3.msra.mxu1 %v610_v9 }
 0x15a   : > { %1065 = vmatprep.subr.mxu1 %v1300_v0 }
 0x15b   : > { %1066 = vmatpush3.msra.mxu1 %v609_v10 }
 0x15c   : > { %1067 = vmatprep.subr.mxu1 %v1300_v0 }
 0x15d   : > { %1068 = vmatpush3.msra.mxu1 %v608_v11 }
 0x1fe   : > { %v507_v6 = vpop.f32.mrf.mxu1 }
 0x1ff   : > { %v508_v7 = vadd.f32 %v853_v5, %v507_v6 }
 0x200   : > { %v1001_v8 = vpop.f32.mrf.mxu1 }
 0x201   : > { %1035 = vmatmul.mubr.f32.vlgmr.msra.gmra.mxu0 %v508_v7 }
 0x2c1   : > { %v602_v13 = vpop.f32.mrf.mxu0 }
 0x2c2   : > { %v603_v14 = vadd.f32 %v855_v12, %v602_v13 }
 0x2c3   : > { %v1036_v15 = vpop.f32.mrf.mxu0 }
 0x2c4   : > { %v606_v16 = vmax.f32 %v603_v14, 0.0 }
 0x2c6   : > { %1070 = vmatmul.mubr.f32.vlgmr.msra.gmra.mxu1 %v606_v16 }
 0x386   : > { %v698_v20 = vpop.f32.mrf.mxu1 }
 0x387   : > { %v699_v0 = vadd.f32 %v857_v19, %v698_v20 }
 0x388   : > { %v1071_v21 = vpop.f32.mrf.mxu1 }
 0x389   : > { %v707_v22 = vsel %vm706_vm1, %v699_v0, 0.0 }
 0x38a   : > { %708 = vadd.xlane.f32.xlu0 %v707_v22 }
 0x413   : > { %v709_v23 = vpop.xlane.xlu0 %708 }
 0x414   : > { %v711_v24 = vmul.f32 0.03125, %v709_v23 }
 0x416   : > { %v712_v25 = vsub.f32 %v699_v0, %v711_v24 }
 0x418   : > { %v713_v26 = vsel %vm706_vm1, %v712_v25, 0.0 }
 0x419   : > { %v714_v27 = vmul.f32 %v713_v26, %v713_v26  ;;  %v727_v32 = vmul.f32 %v858_v31, %v713_v26 }
 0x41b   : > { %715 = vadd.xlane.f32.xlu0 %v714_v27 }
 0x4a4   : > { %v716_v28 = vpop.xlane.xlu0 %715 }
 0x4a5   : > { %v718_v29 = vmul.f32 0.032258064, %v716_v28 }
 0x4a7   : > { %v719_v30 = vadd.f32 1e-06, %v718_v29 }
 0x4a9   : > { %1143 = vrsqrt.f32 %v719_v30 }
 0x4b6   : > { %v1144_v33 = vpop.eup %1143 }
 0x4b7   : > { %v728_v35 = vmul.f32 %v1144_v33, %v727_v32 }
 0x4b9   : > { %v735_v36 = vadd.f32 %v859_v34, %v728_v35 }
 0x4bb   : > { %736 = vst [vmem:[%s322_s3] sm:$0xff] %v735_v36 }
 0x4bc   : > { %1238 = shalt.err (!%p1235_p9)
}
 0x4bd   : > { %s1239_s10 = scalar_lea.hbm %s749_s20, 128  ;;  %s1243_s15 = scalar_lea.hbm %s1612_s7, 256 }
 0x4be   : > { %p1240_p13 = scmp.ne.s32.totalorder %s749_s20, %s1239_s10  ;;  %p1244_p4 = scmp.lt.s32.totalorder %s749_s20, %s1612_s7 }
 0x4bf   : > { %p1245_p8 = scmp.lt.s32.totalorder %s1243_s15, %s1239_s10 }
 0x4c0   : > { %p1241_p5 = pnand %p1240_p13, %p1632_p0 }
 0x4c1   : > { %p1246_p3 = por %p1245_p8, %p1244_p4 }
 0x4c2   : > { %p1242_p10 = pneg %p1241_p5 }
 0x4c4   : > { %p1247_p11 = pnand %p1246_p3, %p1242_p10 }
 0x4c6   : > { %1250 = shalt.err (!%p1247_p11)
}
 0x4c7   : > { %1082 = dma.vmem_to_hbm [thread:$0]  (%p1632_p0), %s752_s30, 128, %s749_s20, %s738_s21  }
 0x4c8 PF: > { %s763_s1 = sand.u32 1, %s1281_s24   ;;  %p1633_p1 = scmp.ne.s32.totalorder %s1620_s8, 0 }
 0x4c9   : > { %p1634_p2 = scmp.ge.s32.totalorder %s1293_s27, 2  ;;  %s764_s3 = scalar_lea.sflag [#allocation4], %s763_s1 }
 0x4cb   : > { %p1096_p6 = pnand %p1634_p2, %p1633_p1 }
 0x4cd   : > { %p1097_p12 = pneg %p1096_p6 }
 0x4cf   : > { %1276 = dma.done.wait (%p1097_p12), %s764_s3, 128  }
 0x4d0   : > { %1278 = vsyncadd (%p1097_p12), %s764_s3, 4294967168  ;;  %p21_p7 = scmp.ge.s32.totalorder %s1415_s23, 4   ;;  %s1635_s24 = smov %s1285_s25 }
 0x4d1   : > { %s1636_s25 = smov %s1289_s26  ;;  %s1637_s26 = smov %s1431_s12 }
 0x4d2   : > { %s1638_s27 = smov %s1415_s23  ;;  %23 = sbr.rel (!%p21_p7) target bundleno = 9 (0x9), region = 105 }
 0x4d7   :  { %769 = vsyncpa [#allocation3], 1 }
 0x4d8   :  { %771 = vsyncpa [#allocation3 + $0x1], 1 }
 0x4d9   :  { %772 = vsyncpa [#allocation6], 1 }
 0x4da   :  { %773 = vsyncpa [#allocation4], 1 }
 0x4db   :  { %775 = vsyncpa [#allocation4 + $0x1], 1 }

</bundles_post_ra>
